<compile_context>
chip_gen: v7x
topology: tpu7x:2x2x1
jax: 0.10.0
libtpu: 0.0.40
codegen_flags: <defaults>
</compile_context>

<pallas_src>
import jax
import jax.numpy as jnp
from jax.experimental import pallas as pl
from jax.experimental.pallas import tpu as pltpu

# Above this many bytes the copy is split into 2 disjoint leading-dim halves so
# dimension_semantics=("parallel",) can shard the DMA issue across both v7x
# TensorCores.  Below it, a single DMA is strictly cheaper.
_SPLIT_BYTES = 64 * 1024 * 1024


def _make_identity_dma_kernel(num_steps: int):
    """Build a kernel that DMA-copies x_ref -> o_ref entirely in HBM."""

    def kernel(x_ref, o_ref, sem):
        if num_steps == 1:
            cp = pltpu.make_async_copy(x_ref, o_ref, sem)
        else:
            # Grid steps own disjoint, contiguous leading-dim slices.
            rows = x_ref.shape[0] // num_steps  # static; divisibility checked below
            sl = pl.ds(pl.program_id(0) * rows, rows)
            cp = pltpu.make_async_copy(x_ref.at[sl], o_ref.at[sl], sem)
        cp.start()
        cp.wait()

    return kernel


def base_model_forward(x: jnp.ndarray) -> jnp.ndarray:
    """Identity forward pass realized as a direct HBM->HBM DMA in Pallas."""
    if x.size == 0:
        return x

    # Kernel operates on an array with at least one dimension.
    xk = x if x.ndim >= 1 else x.reshape(1)

    nbytes = x.size * jnp.dtype(x.dtype).itemsize
    leading = xk.shape[0]
    num_steps = 2 if (nbytes >= _SPLIT_BYTES and leading >= 2 and leading % 2 == 0) else 1

    grid = () if num_steps == 1 else (num_steps,)
    cp_kwargs = dict(has_side_effects=True)
    if grid:
        cp_kwargs["dimension_semantics"] = ("parallel",)

    out = pl.pallas_call(
        _make_identity_dma_kernel(num_steps),
        out_shape=jax.ShapeDtypeStruct(xk.shape, xk.dtype),
        grid=grid,
        in_specs=[pl.BlockSpec(memory_space=pl.ANY)],
        out_specs=pl.BlockSpec(memory_space=pl.ANY),
        scratch_shapes=[pltpu.SemaphoreType.DMA(())],
        compiler_params=pltpu.CompilerParams(**cp_kwargs),
        cost_estimate=pl.CostEstimate(
            flops=0, transcendentals=0, bytes_accessed=2 * nbytes
        ),
    )(xk)

    return out if x.ndim >= 1 else out.reshape(x.shape)


if __name__ == "__main__":
    key = jax.random.PRNGKey(0)
    # Small NCHW input consistent with a typical model input.
    x = jax.random.normal(key, (2, 4, 16, 16), dtype=jnp.float32)

    y = base_model_forward(x)
    jax.block_until_ready(y)

    # Identity semantics check.
    assert y.shape == x.shape
    assert y.dtype == x.dtype
    assert bool(jnp.allclose(y, x))

    print("KERNEL_OK")
</pallas_src>

<mosaic_0001>
module attributes {stable_mosaic.version = 11 : i64} {
  func.func @kernel(%arg0: memref<2x4x16x16xf32, #tpu.memory_space<any>>, %arg1: memref<2x4x16x16xf32, #tpu.memory_space<any>>, %arg2: memref<!tpu.dma_semaphore, #tpu.memory_space<semaphore_mem>>) attributes {dimension_semantics = [], scalar_prefetch = 0 : i64, scratch_operands = 1 : i64, tpu.core_type = #tpu.core_type<tc>} {
    tpu.enqueue_dma source(%arg0 : memref<2x4x16x16xf32, #tpu.memory_space<any>>) target(%arg1 : memref<2x4x16x16xf32, #tpu.memory_space<any>>) target_semaphore(%arg2 : memref<!tpu.dma_semaphore, #tpu.memory_space<semaphore_mem>>)
    tpu.wait_dma2 semaphore(%arg2 : memref<!tpu.dma_semaphore, #tpu.memory_space<semaphore_mem>>) src(%arg0 : memref<2x4x16x16xf32, #tpu.memory_space<any>>) dst(%arg1 : memref<2x4x16x16xf32, #tpu.memory_space<any>>)
    return
  }
}

</mosaic_0001>

<bundles_post_ra>
// kernel: tpu_custom_call.1
= control target key start
LH: loop header
LB: loop body
LE: loop exit
PB: predicated region body
PF: predicated region fallthrough
CT: control target
= control target key end

     0   :  { %s36_s6 = smov [#allocation2]   ;;  %s37_s7 = smov [#allocation3]   ;;  %s55_s0 = inlined_call_operand.hbm [shape: f32[2,4,16,16], index: 0, kind: input, shape index: {}]   ;;  %s56_s1 = inlined_call_operand.hbm [shape: f32[2,4,16,16], index: 1, kind: output, shape index: {}]  }
   0x1   :  { %s38_s8 = smov 0  }
   0x2   :  { %18 = dma.general %s55_s0, 2048, %s56_s1, %s36_s6, %s37_s7, [#allocation4], %s38_s8, 0  }
   0x3   :  { %34 = dma.done.wait [#allocation2], 2048 }
   0x4   :  { %35 = vsyncadd [#allocation2], 4294965248 }
   0x5   :  { %24 = vsyncmov [#allocation2] }
   0x8   :  { %s25_s13 = vpop.sfrf %24 }
   0x9   :  { %p30_p0 = scmp.ne.s32.totalorder %s25_s13, 0 }
   0xb   :  { %29 = shalt.err (%p30_p0)  }

</bundles_post_ra>
